<compile_context>
chip_gen: v7x
topology: tpu7x:2x2x1
jax: 0.10.0
libtpu: 0.0.40
codegen_flags: <defaults>
</compile_context>

<pallas_src>
import functools

import jax
import jax.numpy as jnp
from jax.experimental import pallas as pl
from jax.experimental.pallas import tpu as pltpu


def _round_up(x, m):
    return ((x + m - 1) // m) * m


def _tpu_mlp_config():
    """Per-generation defaults: (tile_t, tile_i, vmem_limit_bytes, tensorcores)."""
    kind = ""
    try:
        kind = jax.devices()[0].device_kind.lower()
    except Exception:
        pass
    if "v7" in kind:
        # 64 MiB VMEM / TC, 2 TCs/chip, ~310 FLOP/byte compute-bound threshold.
        return dict(tile_t=512, tile_i=256, vmem=48 * 1024 * 1024, cores=2)
    if "v6" in kind:
        # 128 MiB VMEM, ~650 FLOP/byte threshold -> big token tile.
        return dict(tile_t=768, tile_i=512, vmem=100 * 1024 * 1024, cores=1)
    if "v5e" in kind or "v5 lite" in kind or "v5lite" in kind:
        # ~240 FLOP/byte threshold: tile_t=256 already at the knee.
        return dict(tile_t=256, tile_i=512, vmem=96 * 1024 * 1024, cores=1)
    # Unknown chip (v4 / v5p / interpret): conservative middle ground.
    return dict(tile_t=512, tile_i=512, vmem=64 * 1024 * 1024, cores=1)


def _pick_tile_i(I, tile_i):
    """Largest usable intermediate tile: multiple of 128 that divides I."""
    tile_i = min(tile_i, I)
    if tile_i >= 128 and I % tile_i == 0 and tile_i % 128 == 0:
        return tile_i
    for cand in range((tile_i // 128) * 128, 0, -128):
        if I % cand == 0:
            return cand
    return I  # tiny / odd I: single tile


def _qwen2_mlp_kernel(x_ref, wgu_ref, wd_ref, o_ref, acc_ref, *, tile_i):
    # Grid = (token tiles [parallel], intermediate tiles [arbitrary/reduction]).
    j = pl.program_id(1)  # reduction axis (innermost)

    @pl.when(j == 0)
    def _():
        acc_ref[...] = jnp.zeros_like(acc_ref)

    x = x_ref[...]                                                  # (tile_t, H)
    # Fused gate/up projection: one MXU pass over the (H, 2*tile_i) weight tile.
    gu = jnp.dot(x, wgu_ref[...],
                 preferred_element_type=jnp.float32)                # (tile_t, 2*tile_i)
    gate = gu[:, :tile_i]
    up = gu[:, tile_i:]
    h = (gate * jax.nn.sigmoid(gate)) * up                          # SiLU(gate) * up
    # Accumulate the down-projection over intermediate tiles (f32 accumulator).
    acc_ref[...] += jnp.dot(h.astype(wd_ref.dtype), wd_ref[...],
                            preferred_element_type=jnp.float32)     # (tile_t, H)

    @pl.when(j == pl.num_programs(1) - 1)
    def _():
        o_ref[...] = acc_ref[...].astype(o_ref.dtype)


def prepare_qwen2_mlp_weights(gate_w, up_w, down_w, *, tile_i=None):
    """Transpose + fuse + pre-block the PyTorch-layout weights ONCE (load time).

    gate_w, up_w: (I, H); down_w: (H, I)  (torch nn.Linear layout).
    Returns:
      wgu : (n_i, H, 2*tile_i)  -- per-intermediate-tile contiguous [gate | up]
                                   slabs; tile_i is baked into the shape.
      wd_t: (I, H)              -- down_proj transposed; contiguous per row tile.
    """
    I, H = gate_w.shape
    assert up_w.shape == (I, H) and down_w.shape == (H, I)
    if tile_i is None:
        tile_i = _tpu_mlp_config()["tile_i"]
    tile_i = _pick_tile_i(I, tile_i)
    n_i = I // tile_i
    gt = gate_w.T.reshape(H, n_i, tile_i)                 # (H, n_i, tile_i)
    ut = up_w.T.reshape(H, n_i, tile_i)
    wgu = jnp.concatenate([gt, ut], axis=2)               # (H, n_i, 2*tile_i)
    wgu = jnp.transpose(wgu, (1, 0, 2))                   # (n_i, H, 2*tile_i) contiguous blocks
    wd_t = down_w.T                                       # (I, H)
    return wgu, wd_t


def qwen2_mlp(hidden_state, wgu, wd_t, *, tile_t=None, vmem_limit_bytes=None,
              weight_buffer_count=None):
    """hidden_state: (B, S, H); wgu/wd_t from prepare_qwen2_mlp_weights."""
    B, S, H = hidden_state.shape
    n_i, Hw, two_ti = wgu.shape
    tile_i = two_ti // 2                      # tile_i is baked into wgu's shape
    I = n_i * tile_i
    assert Hw == H, "wgu hidden dim mismatch"
    assert wd_t.shape == (I, H), "wd_t shape mismatch"

    cfg = _tpu_mlp_config()
    if tile_t is None:
        tile_t = cfg["tile_t"]
    if vmem_limit_bytes is None:
        vmem_limit_bytes = cfg["vmem"]

    T = B * S
    # Token-tile multiple: 8 rows/vreg for 4-byte, 16 for 2-byte, 32 for 1-byte.
    itemsize = jnp.dtype(hidden_state.dtype).itemsize
    mult = max(8, 32 // max(1, itemsize))

    tile_t = max(mult, min(_round_up(tile_t, mult), _round_up(T, mult)))
    # On dual-TensorCore chips make sure the "parallel" token axis has >= 2
    # tiles so both cores get work.
    if cfg["cores"] >= 2 and T >= 2 * mult:
        half = _round_up(pl.cdiv(T, 2), mult)
        tile_t = min(tile_t, half)
    Tp = _round_up(T, tile_t)

    x = hidden_state.reshape(T, H)
    if Tp != T:
        x = jnp.pad(x, ((0, Tp - T), (0, 0)))

    n_t = Tp // tile_t

    kernel = functools.partial(_qwen2_mlp_kernel, tile_i=tile_i)

    # Weight BlockSpecs. wgu blocks are contiguous (n_i, H, 2*tile_i) slabs;
    # the leading dim is squeezed away so the kernel sees (H, 2*tile_i).
    buf_kw = {}
    if weight_buffer_count is not None:
        buf_kw["pipeline_mode"] = pl.Buffered(weight_buffer_count)
    wgu_spec = pl.BlockSpec((None, H, 2 * tile_i), lambda i, j: (j, 0, 0), **buf_kw)
    wd_spec = pl.BlockSpec((tile_i, H), lambda i, j: (j, 0), **buf_kw)

    out_itemsize = jnp.dtype(hidden_state.dtype).itemsize
    cost = pl.CostEstimate(
        flops=6 * T * H * I,                        # gate + up + down matmuls
        transcendentals=T * I,                      # sigmoid in SiLU
        bytes_accessed=int(x.size * itemsize
                           + wgu.size * jnp.dtype(wgu.dtype).itemsize
                           + wd_t.size * jnp.dtype(wd_t.dtype).itemsize
                           + Tp * H * out_itemsize),
    )

    out = pl.pallas_call(
        kernel,
        out_shape=jax.ShapeDtypeStruct((Tp, H), hidden_state.dtype),
        grid_spec=pltpu.PrefetchScalarGridSpec(
            num_scalar_prefetch=0,
            grid=(n_t, n_i),
            in_specs=[
                pl.BlockSpec((tile_t, H), lambda i, j: (i, 0)),        # x tile (resident over j)
                wgu_spec,                                              # fused [gate|up] block
                wd_spec,                                               # down-proj block
            ],
            out_specs=pl.BlockSpec((tile_t, H), lambda i, j: (i, 0)),  # resident over reduction
            scratch_shapes=[pltpu.VMEM((tile_t, H), jnp.float32)],
        ),
        compiler_params=pltpu.CompilerParams(
            dimension_semantics=("parallel", "arbitrary"),
            vmem_limit_bytes=vmem_limit_bytes,
        ),
        cost_estimate=cost,
    )(x, wgu, wd_t)

    if Tp != T:
        out = out[:T]
    return out.reshape(B, S, H)


if __name__ == "__main__":
    # Small Qwen2-ish config.
    batch, seq = 2, 8
    hidden_size = 128
    intermediate_size = 512

    key = jax.random.PRNGKey(0)
    k_x, k_g, k_u, k_d = jax.random.split(key, 4)

    x = jax.random.normal(k_x, (batch, seq, hidden_size), dtype=jnp.float32)
    # PyTorch nn.Linear layout: (out_features, in_features).
    gate_w = jax.random.normal(k_g, (intermediate_size, hidden_size), jnp.float32) * 0.02
    up_w = jax.random.normal(k_u, (intermediate_size, hidden_size), jnp.float32) * 0.02
    down_w = jax.random.normal(k_d, (hidden_size, intermediate_size), jnp.float32) * 0.02

    # Done once at "load time" (no per-call weight transposes); tile_i is baked
    # into wgu's shape so there is no prepare/call mismatch.
    wgu, wd_t = prepare_qwen2_mlp_weights(gate_w, up_w, down_w)

    out = qwen2_mlp(x, wgu, wd_t)
    out = jax.block_until_ready(out)

    # Pure-JAX reference check (f32).
    g = x @ gate_w.T
    u = x @ up_w.T
    ref = (g * jax.nn.sigmoid(g) * u) @ down_w.T
    assert out.shape == (batch, seq, hidden_size)
    assert jnp.allclose(out, ref, atol=1e-4, rtol=1e-4), "mismatch vs reference"

    # bf16 smoke test (production dtype); accumulation stays f32, so only a
    # loose/finite check vs the f32 reference is appropriate here.
    out_bf16 = qwen2_mlp(x.astype(jnp.bfloat16),
                         wgu.astype(jnp.bfloat16),
                         wd_t.astype(jnp.bfloat16))
    out_bf16 = jax.block_until_ready(out_bf16)
    assert out_bf16.shape == (batch, seq, hidden_size)
    assert bool(jnp.all(jnp.isfinite(out_bf16.astype(jnp.float32))))

    print("KERNEL_OK")
</pallas_src>

<mosaic_0001>
module attributes {stable_mosaic.version = 11 : i64} {
  func.func @_qwen2_mlp_kernel(%arg0: i32, %arg1: i32, %arg2: memref<16x128xf32, #tpu.memory_space<vmem>>, %arg3: memref<1x128x1024xf32, #tpu.memory_space<vmem>>, %arg4: memref<512x128xf32, #tpu.memory_space<vmem>>, %arg5: memref<16x128xf32, #tpu.memory_space<vmem>>, %arg6: memref<16x128xf32, #tpu.memory_space<vmem>>) attributes {dimension_semantics = [#tpu.dimension_semantics<parallel>, #tpu.dimension_semantics<arbitrary>], iteration_bounds = array<i64: 1, 1>, scalar_prefetch = 0 : i64, scratch_operands = 1 : i64, tpu.core_type = #tpu.core_type<tc>, window_params = [{transform_indices = @transform_0, window_bounds = array<i64: 16, 128>}, {transform_indices = @transform_1, window_bounds = array<i64: 1, 128, 1024>}, {transform_indices = @transform_2, window_bounds = array<i64: 512, 128>}, {transform_indices = @transform_3, window_bounds = array<i64: 16, 128>}]} {
    %c0_i32 = arith.constant 0 : i32
    %0 = arith.cmpi eq, %arg1, %c0_i32 : i32
    %1 = arith.extui %0 : i1 to i32
    %c0_i32_0 = arith.constant 0 : i32
    %2 = arith.cmpi ne, %1, %c0_i32_0 : i32
    scf.if %2 {
      %cst_15 = arith.constant 0.000000e+00 : f32
      %24 = vector.broadcast %cst_15 : f32 to vector<16x128xf32>
      %c0_16 = arith.constant 0 : index
      %c0_17 = arith.constant 0 : index
      %25 = vector.load %arg6[%c0_16, %c0_17] : memref<16x128xf32, #tpu.memory_space<vmem>>, vector<16x128xf32>
      tpu.vector_store %arg6[%c0_16, %c0_17], %24 {strides = array<i32>} : memref<16x128xf32, #tpu.memory_space<vmem>>, vector<16x128xf32>,
    } else {
    }
    %c0 = arith.constant 0 : index
    %c0_1 = arith.constant 0 : index
    %3 = vector.load %arg2[%c0, %c0_1] : memref<16x128xf32, #tpu.memory_space<vmem>>, vector<16x128xf32>
    %c0_2 = arith.constant 0 : index
    %c0_3 = arith.constant 0 : index
    %c0_4 = arith.constant 0 : index
    %4 = vector.load %arg3[%c0_2, %c0_3, %c0_4] : memref<1x128x1024xf32, #tpu.memory_space<vmem>>, vector<1x128x1024xf32>
    %5 = vector.shape_cast %4 : vector<1x128x1024xf32> to vector<128x1024xf32>
    %cst = arith.constant dense<0.000000e+00> : vector<16x1024xf32>
    %6 = tpu.matmul %3, %5, %cst {dimension_numbers = #tpu.dot_dimension_numbers<[1], [0], [0], [1], [0, 0, 1, 1], [], []>} : vector<16x128xf32>, vector<128x1024xf32>, vector<16x1024xf32> -> vector<16x1024xf32>
    %7 = vector.extract_strided_slice %6 {offsets = [0, 0], sizes = [16, 512], strides = [1, 1]} : vector<16x1024xf32> to vector<16x512xf32>
    %8 = vector.extract_strided_slice %6 {offsets = [0, 512], sizes = [16, 512], strides = [1, 1]} : vector<16x1024xf32> to vector<16x512xf32>
    %9 = arith.negf %7 : vector<16x512xf32>
    %10 = math.exp %9 : vector<16x512xf32>
    %cst_5 = arith.constant 1.000000e+00 : f32
    %11 = vector.broadcast %cst_5 : f32 to vector<16x512xf32>
    %12 = arith.addf %11, %10 : vector<16x512xf32>
    %13 = arith.divf %11, %12 : vector<16x512xf32>
    %14 = arith.mulf %7, %13 : vector<16x512xf32>
    %15 = arith.mulf %14, %8 : vector<16x512xf32>
    %c0_6 = arith.constant 0 : index
    %c0_7 = arith.constant 0 : index
    %16 = vector.load %arg6[%c0_6, %c0_7] : memref<16x128xf32, #tpu.memory_space<vmem>>, vector<16x128xf32>
    %c0_8 = arith.constant 0 : index
    %c0_9 = arith.constant 0 : index
    %17 = vector.load %arg4[%c0_8, %c0_9] : memref<512x128xf32, #tpu.memory_space<vmem>>, vector<512x128xf32>
    %cst_10 = arith.constant dense<0.000000e+00> : vector<16x128xf32>
    %18 = tpu.matmul %15, %17, %cst_10 {dimension_numbers = #tpu.dot_dimension_numbers<[1], [0], [0], [1], [0, 0, 1, 1], [], []>} : vector<16x512xf32>, vector<512x128xf32>, vector<16x128xf32> -> vector<16x128xf32>
    %19 = arith.addf %16, %18 : vector<16x128xf32>
    %c0_11 = arith.constant 0 : index
    %c0_12 = arith.constant 0 : index
    %20 = vector.load %arg6[%c0_11, %c0_12] : memref<16x128xf32, #tpu.memory_space<vmem>>, vector<16x128xf32>
    tpu.vector_store %arg6[%c0_11, %c0_12], %19 {strides = array<i32>} : memref<16x128xf32, #tpu.memory_space<vmem>>, vector<16x128xf32>,
    %c0_i32_13 = arith.constant 0 : i32
    %21 = arith.cmpi eq, %arg1, %c0_i32_13 : i32
    %22 = arith.extui %21 : i1 to i32
    %c0_i32_14 = arith.constant 0 : i32
    %23 = arith.cmpi ne, %22, %c0_i32_14 : i32
    scf.if %23 {
      %c0_15 = arith.constant 0 : index
      %c0_16 = arith.constant 0 : index
      %24 = vector.load %arg6[%c0_15, %c0_16] : memref<16x128xf32, #tpu.memory_space<vmem>>, vector<16x128xf32>
      %c0_17 = arith.constant 0 : index
      %c0_18 = arith.constant 0 : index
      %25 = vector.load %arg5[%c0_17, %c0_18] : memref<16x128xf32, #tpu.memory_space<vmem>>, vector<16x128xf32>
      tpu.vector_store %arg5[%c0_17, %c0_18], %24 {strides = array<i32>} : memref<16x128xf32, #tpu.memory_space<vmem>>, vector<16x128xf32>,
    } else {
    }
    return
  }
  func.func @transform_0(%arg0: i32, %arg1: i32) -> (i32, i32) {
    %c0_i32 = arith.constant 0 : i32
    %c0_i32_0 = arith.constant 0 : i32
    return %arg0, %c0_i32 : i32, i32
  }
  func.func @transform_1(%arg0: i32, %arg1: i32) -> (i32, i32, i32) {
    %c0_i32 = arith.constant 0 : i32
    %c0_i32_0 = arith.constant 0 : i32
    %c0_i32_1 = arith.constant 0 : i32
    return %arg1, %c0_i32, %c0_i32_0 : i32, i32, i32
  }
  func.func @transform_2(%arg0: i32, %arg1: i32) -> (i32, i32) {
    %c0_i32 = arith.constant 0 : i32
    %c0_i32_0 = arith.constant 0 : i32
    return %arg1, %c0_i32 : i32, i32
  }
  func.func @transform_3(%arg0: i32, %arg1: i32) -> (i32, i32) {
    %c0_i32 = arith.constant 0 : i32
    %c0_i32_0 = arith.constant 0 : i32
    return %arg0, %c0_i32 : i32, i32
  }
}

</mosaic_0001>

<bundles_post_ra>
// kernel: tpu_custom_call.1
= control target key start
LH: loop header
LB: loop body
LE: loop exit
PB: predicated region body
PF: predicated region fallthrough
CT: control target
= control target key end

     0   :  { %8 = vsyncpa [#allocation4], 0  ;;  %s1326_s0 = inlined_call_operand.hbm [shape: f32[16,128], index: 0, kind: input, shape index: {}]   ;;  %s1327_s1 = inlined_call_operand.hbm [shape: f32[1,128,1024], index: 1, kind: input, shape index: {}]   ;;  %s1328_s2 = inlined_call_operand.hbm [shape: f32[512,128], index: 2, kind: input, shape index: {}]   ;;  %s1329_s3 = inlined_call_operand.hbm [shape: f32[16,128], index: 3, kind: output, shape index: {}]  }
   0x1   :  { %9 = vsyncpa [#allocation7], 0 }
   0x2   :  { %10 = vsyncpa [#allocation5], 0  ;;  %s1220_s12 = smov [#allocation6]   ;;  %s1126_s16 = scalar_lea.hbm %s1327_s1, 16384 }
   0x3   :  { %s28_s13 = sshll.u32 %s1220_s12, 4  ;;  %p1127_p0 = scmp.ne.s32.totalorder %s1327_s1, %s1126_s16  ;;  %s29_s13 = int_to_ptr.vmem [resolvable:$true] %s28_s13 }
   0x4   :  { %p1130_p1 = scmp.lt.u32.totalorder %s1126_s16, %s1327_s1 }
   0x6   :  { %p1132_p2 = pnand %p1130_p1, %p1127_p0 }
   0x8   :  { %1135 = shalt.err (!%p1132_p2)
}
   0x9   :  { %s1136_s21 = scalar_lea.vmem %s29_s13, 16384  ;;  %p1141_p4 = scmp.lt.s32.totalorder %s29_s13, %s29_s13 }
   0xa   :  { %p1137_p3 = scmp.ne.s32.totalorder %s29_s13, %s1136_s21  ;;  %p1142_p5 = scmp.lt.s32.totalorder %s1136_s21, %s1136_s21 }
   0xc   :  { %p1143_p6 = por %p1142_p5, %p1141_p4 }
   0xe   :  { %p1144_p7 = pnand %p1143_p6, %p1137_p3 }
  0x10   :  { %1147 = shalt.err (!%p1144_p7)
}
  0x11   :  { %s1221_s22 = smov 1024   ;;  %s1222_s23 = smov 64  }
  0x12   :  { %34 = dma.hbm_to_vmem [thread:$0]  %s1327_s1, 16384, %s29_s13, [#allocation7], %s1221_s22, %s1221_s22, %s1222_s23  }
  0x13   :  { %s1223_s26 = smov [#allocation3]   ;;  %s1148_s30 = scalar_lea.hbm %s1326_s0, 256 }
  0x14   :  { %s16_s27 = sshll.u32 %s1223_s26, 4  ;;  %p1149_p8 = scmp.ne.s32.totalorder %s1326_s0, %s1148_s30  ;;  %s17_s27 = int_to_ptr.vmem [resolvable:$true] %s16_s27 }
  0x15   :  { %p1152_p9 = scmp.lt.u32.totalorder %s1148_s30, %s1326_s0 }
  0x17   :  { %p1154_p10 = pnand %p1152_p9, %p1149_p8 }
  0x19   :  { %1157 = shalt.err (!%p1154_p10)
}
  0x1a   :  { %s1158_s8 = scalar_lea.vmem %s17_s27, 256  ;;  %p1163_p12 = scmp.lt.s32.totalorder %s17_s27, %s17_s27 }
  0x1b   :  { %p1159_p11 = scmp.ne.s32.totalorder %s17_s27, %s1158_s8  ;;  %p1164_p13 = scmp.lt.s32.totalorder %s1158_s8, %s1158_s8 }
  0x1d   :  { %p1165_p0 = por %p1164_p13, %p1163_p12 }
  0x1f   :  { %p1166_p1 = pnand %p1165_p0, %p1159_p11 }
  0x21   :  { %1169 = shalt.err (!%p1166_p1)
}
  0x22   :  { %s1224_s1 = smov 128   ;;  %s1225_s9 = smov 8  }
  0x23   :  { %22 = dma.hbm_to_vmem [thread:$0]  %s1326_s0, 256, %s17_s27, [#allocation4], %s1224_s1, %s1224_s1, %s1225_s9  }
  0x24   :  { %s1226_s12 = smov [#allocation8]   ;;  %s1170_s16 = scalar_lea.hbm %s1328_s2, 8192 }
  0x25   :  { %s40_s13 = sshll.u32 %s1226_s12, 4  ;;  %p1171_p2 = scmp.ne.s32.totalorder %s1328_s2, %s1170_s16  ;;  %s41_s13 = int_to_ptr.vmem [resolvable:$true] %s40_s13 }
  0x26   :  { %p1174_p3 = scmp.lt.u32.totalorder %s1170_s16, %s1328_s2 }
  0x28   :  { %p1176_p4 = pnand %p1174_p3, %p1171_p2 }
  0x2a   :  { %1179 = shalt.err (!%p1176_p4)
}
  0x2b   :  { %s1180_s21 = scalar_lea.vmem %s41_s13, 8192  ;;  %p1185_p6 = scmp.lt.s32.totalorder %s41_s13, %s41_s13 }
  0x2c   :  { %p1181_p5 = scmp.ne.s32.totalorder %s41_s13, %s1180_s21  ;;  %p1186_p7 = scmp.lt.s32.totalorder %s1180_s21, %s1180_s21 }
  0x2e   :  { %p1187_p8 = por %p1186_p7, %p1185_p6 }
  0x30   :  { %p1188_p9 = pnand %p1187_p8, %p1181_p5 }
  0x32   :  { %1191 = shalt.err (!%p1188_p9)
}
  0x33   :  { %46 = dma.hbm_to_vmem [thread:$0]  %s1328_s2, 8192, %s41_s13, [#allocation7], %s1224_s1, %s1224_s1, %s1225_s9  }
  0x34   :  { %1214 = dma.done.wait [#allocation4], 256  }
  0x35   :  { %1215 = vsyncadd [#allocation4], 4294967040 }
  0x36   :  { %1216 = dma.done.wait [#allocation7], 24576  }
  0x37   :  { %1217 = vsyncadd [#allocation7], 4294942720  ;;  %v1227_v0 = vmov 0.0   ;;  %v65_v1 = vld [vmem:[#allocation6 + $0x8] sm:$0xff]  ;;  %v67_v3 = vld [vmem:[#allocation6 + $0x18] sm:$0xff]  ;;  %s1228_s2 = smov [#allocation9]  }
  0x38   :  { %256 = vmatprep.mubr.f32.mxu0 %v1227_v0  ;;  %333 = vmatprep.mubr.f32.mxu1 %v1227_v0  ;;  %v73_v2 = vld [vmem:[#allocation6 + $0x48] sm:$0xff]  ;;  %v75_v5 = vld [vmem:[#allocation6 + $0x58] sm:$0xff]  ;;  %v64_v6 = vld [vmem:[#allocation6] sm:$0xff]  ;;  %s796_s23 = sshll.u32 %s1228_s2, 4  ;;  %s797_s23 = int_to_ptr.vmem [resolvable:$true] %s796_s23 }
  0x39   :  { %v893_v4 = vpack.c.bf16 %v73_v2, %v65_v1  ;;  %v72_v7 = vld [vmem:[#allocation6 + $0x40] sm:$0xff]  ;;  %v925_v8 = vpack.c.bf16 %v75_v5, %v67_v3  ;;  %v66_v10 = vld [vmem:[#allocation6 + $0x10] sm:$0xff]  ;;  %v81_v12 = vld [vmem:[#allocation6 + $0x88] sm:$0xff]  ;;  %s1192_s24 = scalar_lea.vmem %s797_s23, 256  ;;  %p1197_p11 = scmp.lt.s32.totalorder %s797_s23, %s797_s23 }
  0x3a   :  { %v895_v9 = vpack.c.bf16 %v72_v7, %v64_v6  ;;  %v74_v11 = vld [vmem:[#allocation6 + $0x50] sm:$0xff]  ;;  %v89_v14 = vld [vmem:[#allocation6 + $0xc8] sm:$0xff]  ;;  %v83_v15 = vld [vmem:[#allocation6 + $0x98] sm:$0xff]  ;;  %p1193_p10 = scmp.ne.s32.totalorder %s797_s23, %s1192_s24  ;;  %p1198_p12 = scmp.lt.s32.totalorder %s1192_s24, %s1192_s24 }
  0x3b   :  { %894 = vmatprep.subr.bf16.mxu0 %v893_v4  ;;  %v927_v13 = vpack.c.bf16 %v74_v11, %v66_v10  ;;  %v91_v16 = vld [vmem:[#allocation6 + $0xd8] sm:$0xff]  ;;  %926 = vmatprep.subr.bf16.mxu1 %v925_v8  ;;  %v897_v17 = vpack.c.bf16 %v89_v14, %v81_v12  ;;  %v80_v19 = vld [vmem:[#allocation6 + $0x80] sm:$0xff]  ;;  %v82_v21 = vld [vmem:[#allocation6 + $0x90] sm:$0xff] }
  0x3c   :  { %896 = vmatpush1.bf16.msra.mxu0 %v895_v9  ;;  %v929_v18 = vpack.c.bf16 %v91_v16, %v83_v15  ;;  %v88_v20 = vld [vmem:[#allocation6 + $0xc0] sm:$0xff]  ;;  %v90_v23 = vld [vmem:[#allocation6 + $0xd0] sm:$0xff]  ;;  %v97_v24 = vld [vmem:[#allocation6 + $0x108] sm:$0xff]  ;;  %p1199_p13 = por %p1198_p12, %p1197_p11 }
  0x3d   :  { %928 = vmatpush1.bf16.msra.mxu1 %v927_v13  ;;  %v899_v22 = vpack.c.bf16 %v88_v20, %v80_v19  ;;  %v105_v25 = vld [vmem:[#allocation6 + $0x148] sm:$0xff]  ;;  %898 = vmatprep.subr.bf16.mxu0 %v897_v17  ;;  %v931_v26 = vpack.c.bf16 %v90_v23, %v82_v21  ;;  %v99_v28 = vld [vmem:[#allocation6 + $0x118] sm:$0xff]  ;;  %v96_v30 = vld [vmem:[#allocation6 + $0x100] sm:$0xff] }
  0x3e   :  { %930 = vmatprep.subr.bf16.mxu1 %v929_v18  ;;  %v901_v27 = vpack.c.bf16 %v105_v25, %v97_v24  ;;  %v107_v29 = vld [vmem:[#allocation6 + $0x158] sm:$0xff]  ;;  %v104_v32 = vld [vmem:[#allocation6 + $0x140] sm:$0xff]  ;;  %v98_v33 = vld [vmem:[#allocation6 + $0x110] sm:$0xff]  ;;  %p1200_p0 = pnand %p1199_p13, %p1193_p10 }
  0x3f   :  { %v933_v31 = vpack.c.bf16 %v107_v29, %v99_v28  ;;  %v106_v34 = vld [vmem:[#allocation6 + $0x150] sm:$0xff]  ;;  %v903_v35 = vpack.c.bf16 %v104_v32, %v96_v30  ;;  %v113_v36 = vld [vmem:[#allocation6 + $0x188] sm:$0xff]  ;;  %v115_v38 = vld [vmem:[#allocation6 + $0x198] sm:$0xff] }
  0x40   :  { %900 = vmatpush1.bf16.msra.mxu0 %v899_v22  ;;  %v121_v37 = vld [vmem:[#allocation6 + $0x1c8] sm:$0xff]  ;;  %v935_v39 = vpack.c.bf16 %v106_v34, %v98_v33  ;;  %v123_v41 = vld [vmem:[#allocation6 + $0x1d8] sm:$0xff]  ;;  %v112_v42 = vld [vmem:[#allocation6 + $0x180] sm:$0xff] }
  0x41   :  { %932 = vmatpush1.bf16.msra.mxu1 %v931_v26  ;;  %902 = vmatprep.subr.bf16.mxu0 %v901_v27  ;;  %v905_v40 = vpack.c.bf16 %v121_v37, %v113_v36  ;;  %v120_v43 = vld [vmem:[#allocation6 + $0x1c0] sm:$0xff]  ;;  %v937_v44 = vpack.c.bf16 %v123_v41, %v115_v38  ;;  %v114_v45 = vld [vmem:[#allocation6 + $0x190] sm:$0xff]  ;;  %v129_v47 = vld [vmem:[#allocation6 + $0x208] sm:$0xff] }
  0x42   :  { %934 = vmatprep.subr.bf16.mxu1 %v933_v31  ;;  %v122_v46 = vld [vmem:[#allocation6 + $0x1d0] sm:$0xff]  ;;  %v137_v48 = vld [vmem:[#allocation6 + $0x248] sm:$0xff]  ;;  %v131_v49 = vld [vmem:[#allocation6 + $0x218] sm:$0xff]  ;;  %v907_v51 = vpack.c.bf16 %v120_v43, %v112_v42 }
  0x43   :  { %v139_v50 = vld [vmem:[#allocation6 + $0x258] sm:$0xff]  ;;  %v939_v52 = vpack.c.bf16 %v122_v46, %v114_v45  ;;  %v909_v53 = vpack.c.bf16 %v137_v48, %v129_v47  ;;  %v128_v54 = vld [vmem:[#allocation6 + $0x200] sm:$0xff]  ;;  %v130_v56 = vld [vmem:[#allocation6 + $0x210] sm:$0xff] }
  0x44   :  { %904 = vmatpush1.bf16.msra.mxu0 %v903_v35  ;;  %v136_v55 = vld [vmem:[#allocation6 + $0x240] sm:$0xff]  ;;  %v941_v57 = vpack.c.bf16 %v139_v50, %v131_v49  ;;  %v138_v58 = vld [vmem:[#allocation6 + $0x250] sm:$0xff]  ;;  %v145_v59 = vld [vmem:[#allocation6 + $0x288] sm:$0xff] }
  0x45   :  { %936 = vmatpush1.bf16.msra.mxu1 %v935_v39  ;;  %906 = vmatprep.subr.bf16.mxu0 %v905_v40  ;;  %v153_v60 = vld [vmem:[#allocation6 + $0x2c8] sm:$0xff]  ;;  %v147_v61 = vld [vmem:[#allocation6 + $0x298] sm:$0xff]  ;;  %v911_v63 = vpack.c.bf16 %v136_v55, %v128_v54  ;;  %v943_v1 = vpack.c.bf16 %v138_v58, %v130_v56  ;;  %v144_v3 = vld [vmem:[#allocation6 + $0x280] sm:$0xff] }
  0x46   :  { %938 = vmatprep.subr.bf16.mxu1 %v937_v44  ;;  %v155_v62 = vld [vmem:[#allocation6 + $0x2d8] sm:$0xff]  ;;  %v913_v2 = vpack.c.bf16 %v153_v60, %v145_v59  ;;  %v152_v4 = vld [vmem:[#allocation6 + $0x2c0] sm:$0xff]  ;;  %v146_v5 = vld [vmem:[#allocation6 + $0x290] sm:$0xff] }
  0x47   :  { %v945_v6 = vpack.c.bf16 %v155_v62, %v147_v61  ;;  %v154_v7 = vld [vmem:[#allocation6 + $0x2d0] sm:$0xff]  ;;  %v161_v8 = vld [vmem:[#allocation6 + $0x308] sm:$0xff]  ;;  %v163_v10 = vld [vmem:[#allocation6 + $0x318] sm:$0xff]  ;;  %v915_v12 = vpack.c.bf16 %v152_v4, %v144_v3 }
  0x48   :  { %908 = vmatpush1.bf16.msra.mxu0 %v907_v51  ;;  %v169_v9 = vld [vmem:[#allocation6 + $0x348] sm:$0xff]  ;;  %v171_v11 = vld [vmem:[#allocation6 + $0x358] sm:$0xff]  ;;  %v947_v13 = vpack.c.bf16 %v154_v7, %v146_v5  ;;  %v160_v15 = vld [vmem:[#allocation6 + $0x300] sm:$0xff] }
  0x49   :  { %940 = vmatpush1.bf16.msra.mxu1 %v939_v52  ;;  %910 = vmatprep.subr.bf16.mxu0 %v909_v53  ;;  %v917_v14 = vpack.c.bf16 %v169_v9, %v161_v8  ;;  %v168_v16 = vld [vmem:[#allocation6 + $0x340] sm:$0xff]  ;;  %v162_v17 = vld [vmem:[#allocation6 + $0x310] sm:$0xff]  ;;  %v949_v18 = vpack.c.bf16 %v171_v11, %v163_v10  ;;  %v177_v20 = vld [vmem:[#allocation6 + $0x388] sm:$0xff] }
  0x4a   :  { %942 = vmatprep.subr.bf16.mxu1 %v941_v57  ;;  %v170_v19 = vld [vmem:[#allocation6 + $0x350] sm:$0xff]  ;;  %v185_v21 = vld [vmem:[#allocation6 + $0x3c8] sm:$0xff]  ;;  %v179_v22 = vld [vmem:[#allocation6 + $0x398] sm:$0xff]  ;;  %v919_v24 = vpack.c.bf16 %v168_v16, %v160_v15 }
  0x4b   :  { %v187_v23 = vld [vmem:[#allocation6 + $0x3d8] sm:$0xff]  ;;  %v951_v25 = vpack.c.bf16 %v170_v19, %v162_v17  ;;  %v921_v26 = vpack.c.bf16 %v185_v21, %v177_v20  ;;  %v176_v27 = vld [vmem:[#allocation6 + $0x380] sm:$0xff]  ;;  %v178_v29 = vld [vmem:[#allocation6 + $0x390] sm:$0xff] }
  0x4c   :  { %912 = vmatpush1.bf16.msra.mxu0 %v911_v63  ;;  %v184_v28 = vld [vmem:[#allocation6 + $0x3c0] sm:$0xff]  ;;  %v953_v30 = vpack.c.bf16 %v187_v23, %v179_v22  ;;  %v186_v31 = vld [vmem:[#allocation6 + $0x3d0] sm:$0xff]  ;;  %v69_v32 = vld [vmem:[#allocation6 + $0x28] sm:$0xff] }
  0x4d   :  { %944 = vmatpush1.bf16.msra.mxu1 %v943_v1  ;;  %914 = vmatprep.subr.bf16.mxu0 %v913_v2  ;;  %v77_v33 = vld [vmem:[#allocation6 + $0x68] sm:$0xff]  ;;  %v71_v34 = vld [vmem:[#allocation6 + $0x38] sm:$0xff]  ;;  %v923_v36 = vpack.c.bf16 %v184_v28, %v176_v27  ;;  %v955_v37 = vpack.c.bf16 %v186_v31, %v178_v29  ;;  %v68_v39 = vld [vmem:[#allocation6 + $0x20] sm:$0xff] }
  0x4e   :  { %946 = vmatprep.subr.bf16.mxu1 %v945_v6  ;;  %v79_v35 = vld [vmem:[#allocation6 + $0x78] sm:$0xff]  ;;  %v957_v38 = vpack.c.bf16 %v77_v33, %v69_v32  ;;  %v76_v40 = vld [vmem:[#allocation6 + $0x60] sm:$0xff]  ;;  %v70_v42 = vld [vmem:[#allocation6 + $0x30] sm:$0xff] }
  0x4f   :  { %v989_v41 = vpack.c.bf16 %v79_v35, %v71_v34  ;;  %v78_v43 = vld [vmem:[#allocation6 + $0x70] sm:$0xff]  ;;  %v85_v44 = vld [vmem:[#allocation6 + $0xa8] sm:$0xff]  ;;  %v959_v47 = vpack.c.bf16 %v76_v40, %v68_v39  ;;  %v87_v48 = vld [vmem:[#allocation6 + $0xb8] sm:$0xff] }
  0x50   :  { %916 = vmatpush1.bf16.msra.mxu0 %v915_v12  ;;  %v93_v45 = vld [vmem:[#allocation6 + $0xe8] sm:$0xff]  ;;  %v1293_v46 = vld [vmem:[#allocation3] sm:$0xff]  ;;  %v95_v49 = vld [vmem:[#allocation6 + $0xf8] sm:$0xff]  ;;  %v991_v50 = vpack.c.bf16 %v78_v43, %v70_v42 }
  0x51   :  { %948 = vmatpush1.bf16.msra.mxu1 %v947_v13  ;;  %918 = vmatprep.subr.bf16.mxu0 %v917_v14  ;;  %v84_v51 = vld [vmem:[#allocation6 + $0xa0] sm:$0xff]  ;;  %v86_v53 = vld [vmem:[#allocation6 + $0xb0] sm:$0xff]  ;;  %v961_v54 = vpack.c.bf16 %v93_v45, %v85_v44  ;;  %v101_v56 = vld [vmem:[#allocation6 + $0x128] sm:$0xff]  ;;  %v993_v58 = vpack.c.bf16 %v95_v49, %v87_v48 }
  0x52   :  { %950 = vmatprep.subr.bf16.mxu1 %v949_v18  ;;  %v92_v52 = vld [vmem:[#allocation6 + $0xe0] sm:$0xff]  ;;  %v94_v55 = vld [vmem:[#allocation6 + $0xf0] sm:$0xff]  ;;  %v109_v57 = vld [vmem:[#allocation6 + $0x168] sm:$0xff] }
  0x53   :  { %v103_v59 = vld [vmem:[#allocation6 + $0x138] sm:$0xff]  ;;  %v963_v62 = vpack.c.bf16 %v92_v52, %v84_v51  ;;  %v995_v63 = vpack.c.bf16 %v94_v55, %v86_v53  ;;  %v965_v1 = vpack.c.bf16 %v109_v57, %v101_v56  ;;  %v100_v2 = vld [vmem:[#allocation6 + $0x120] sm:$0xff]  ;;  %v102_v4 = vld [vmem:[#allocation6 + $0x130] sm:$0xff] }
  0x54   :  { %920 = vmatpush1.bf16.msra.mxu0 %v919_v24  ;;  %v111_v60 = vld [vmem:[#allocation6 + $0x178] sm:$0xff]  ;;  %v108_v3 = vld [vmem:[#allocation6 + $0x160] sm:$0xff]  ;;  %v110_v6 = vld [vmem:[#allocation6 + $0x170] sm:$0xff] }
  0x55   :  { %952 = vmatpush1.bf16.msra.mxu1 %v951_v25  ;;  %922 = vmatprep.subr.bf16.mxu0 %v921_v26  ;;  %v1297_v61 = vld [vmem:[#allocation3 + $0x8] sm:$0xff]  ;;  %v997_v5 = vpack.c.bf16 %v111_v60, %v103_v59  ;;  %v117_v7 = vld [vmem:[#allocation6 + $0x1a8] sm:$0xff]  ;;  %v967_v11 = vpack.c.bf16 %v108_v3, %v100_v2  ;;  %v999_v12 = vpack.c.bf16 %v110_v6, %v102_v4  ;;  %v116_v14 = vld [vmem:[#allocation6 + $0x1a0] sm:$0xff] }
  0x56   :  { %954 = vmatprep.subr.bf16.mxu1 %v953_v30  ;;  %v125_v8 = vld [vmem:[#allocation6 + $0x1e8] sm:$0xff]  ;;  %v119_v9 = vld [vmem:[#allocation6 + $0x1b8] sm:$0xff]  ;;  %v124_v15 = vld [vmem:[#allocation6 + $0x1e0] sm:$0xff] }
  0x57   :  { %v127_v10 = vld [vmem:[#allocation6 + $0x1f8] sm:$0xff]  ;;  %v969_v13 = vpack.c.bf16 %v125_v8, %v117_v7  ;;  %v118_v16 = vld [vmem:[#allocation6 + $0x1b0] sm:$0xff]  ;;  %v133_v19 = vld [vmem:[#allocation6 + $0x228] sm:$0xff]  ;;  %v971_v23 = vpack.c.bf16 %v124_v15, %v116_v14 }
  0x58   :  { %924 = vmatpush1.bf16.msra.mxu0 %v923_v36  ;;  %v1001_v17 = vpack.c.bf16 %v127_v10, %v119_v9  ;;  %v126_v18 = vld [vmem:[#allocation6 + $0x1f0] sm:$0xff]  ;;  %v141_v20 = vld [vmem:[#allocation6 + $0x268] sm:$0xff]  ;;  %v135_v21 = vld [vmem:[#allocation6 + $0x238] sm:$0xff] }
  0x59   :  { %956 = vmatpush1.bf16.msra.mxu1 %v955_v37  ;;  %958 = vmatprep.subr.bf16.mxu0 %v957_v38  ;;  %v143_v22 = vld [vmem:[#allocation6 + $0x278] sm:$0xff]  ;;  %v1003_v24 = vpack.c.bf16 %v126_v18, %v118_v16  ;;  %v973_v25 = vpack.c.bf16 %v141_v20, %v133_v19  ;;  %v132_v26 = vld [vmem:[#allocation6 + $0x220] sm:$0xff]  ;;  %v134_v28 = vld [vmem:[#allocation6 + $0x230] sm:$0xff] }
  0x5a   :  { %990 = vmatprep.subr.bf16.mxu1 %v989_v41  ;;  %v140_v27 = vld [vmem:[#allocation6 + $0x260] sm:$0xff]  ;;  %v1005_v29 = vpack.c.bf16 %v143_v22, %v135_v21  ;;  %v142_v30 = vld [vmem:[#allocation6 + $0x270] sm:$0xff]  ;;  %v149_v31 = vld [vmem:[#allocation6 + $0x2a8] sm:$0xff] }
  0x5b   :  { %257 = vmatmul.mubr.f32.vlgmr.msra.gmra.mrb[0].mxu0 %v1293_v46  ;;  %v157_v32 = vld [vmem:[#allocation6 + $0x2e8] sm:$0xff]  ;;  %v151_v33 = vld [vmem:[#allocation6 + $0x2b8] sm:$0xff]  ;;  %v975_v35 = vpack.c.bf16 %v140_v27, %v132_v26  ;;  %v1007_v36 = vpack.c.bf16 %v142_v30, %v134_v28  ;;  %v148_v38 = vld [vmem:[#allocation6 + $0x2a0] sm:$0xff] }
  0x5c   :  { %334 = vmatmul.mubr.f32.vlgmr.msra.gmra.mrb[0].mxu1 %v1293_v46  ;;  %960 = vmatpush1.bf16.msra.mxu0 %v959_v47  ;;  %v159_v34 = vld [vmem:[#allocation6 + $0x2f8] sm:$0xff]  ;;  %v977_v37 = vpack.c.bf16 %v157_v32, %v149_v31  ;;  %v156_v39 = vld [vmem:[#allocation6 + $0x2e0] sm:$0xff]  ;;  %v150_v40 = vld [vmem:[#allocation6 + $0x2b0] sm:$0xff] }
  0x5d   :  { %992 = vmatpush1.bf16.msra.mxu1 %v991_v50  ;;  %262 = vmatprep.mubr.f32.mxu0 %v1227_v0  ;;  %v1009_v41 = vpack.c.bf16 %v159_v34, %v151_v33  ;;  %v158_v42 = vld [vmem:[#allocation6 + $0x2f0] sm:$0xff]  ;;  %v165_v43 = vld [vmem:[#allocation6 + $0x328] sm:$0xff]  ;;  %v167_v45 = vld [vmem:[#allocation6 + $0x338] sm:$0xff]  ;;  %v979_v48 = vpack.c.bf16 %v156_v39, %v148_v38 }
  0x5e   :  { %339 = vmatprep.mubr.f32.mxu1 %v1227_v0  ;;  %962 = vmatprep.subr.bf16.mxu0 %v961_v54  ;;  %v173_v44 = vld [vmem:[#allocation6 + $0x368] sm:$0xff]  ;;  %v175_v47 = vld [vmem:[#allocation6 + $0x378] sm:$0xff]  ;;  %v1011_v49 = vpack.c.bf16 %v158_v42, %v150_v40  ;;  %v164_v51 = vld [vmem:[#allocation6 + $0x320] sm:$0xff] }
  0x5f   :  { %263 = vmatmul.mubr.f32.gmra.mrb[2].mxu0 %v1297_v61  ;;  %994 = vmatprep.subr.bf16.mxu1 %v993_v58  ;;  %v981_v50 = vpack.c.bf16 %v173_v44, %v165_v43  ;;  %v172_v52 = vld [vmem:[#allocation6 + $0x360] sm:$0xff]  ;;  %v166_v53 = vld [vmem:[#allocation6 + $0x330] sm:$0xff]  ;;  %v1013_v54 = vpack.c.bf16 %v175_v47, %v167_v45  ;;  %v181_v56 = vld [vmem:[#allocation6 + $0x3a8] sm:$0xff] }
  0x60   :  { %340 = vmatmul.mubr.f32.gmra.mrb[2].mxu1 %v1297_v61  ;;  %964 = vmatpush1.bf16.msra.mxu0 %v963_v62  ;;  %v174_v55 = vld [vmem:[#allocation6 + $0x370] sm:$0xff]  ;;  %v189_v57 = vld [vmem:[#allocation6 + $0x3e8] sm:$0xff]  ;;  %v183_v58 = vld [vmem:[#allocation6 + $0x3b8] sm:$0xff]  ;;  %v983_v60 = vpack.c.bf16 %v172_v52, %v164_v51 }
  0x61   :  { %996 = vmatpush1.bf16.msra.mxu1 %v995_v63  ;;  %966 = vmatprep.subr.bf16.mxu0 %v965_v1  ;;  %v191_v59 = vld [vmem:[#allocation6 + $0x3f8] sm:$0xff]  ;;  %v1015_v62 = vpack.c.bf16 %v174_v55, %v166_v53  ;;  %v985_v63 = vpack.c.bf16 %v189_v57, %v181_v56  ;;  %v180_v1 = vld [vmem:[#allocation6 + $0x3a0] sm:$0xff]  ;;  %v182_v4 = vld [vmem:[#allocation6 + $0x3b0] sm:$0xff] }
  0x62   :  { %998 = vmatprep.subr.bf16.mxu1 %v997_v5  ;;  %410 = vmatprep.mubr.f32.mxu0 %v1227_v0  ;;  %v188_v2 = vld [vmem:[#allocation6 + $0x3e0] sm:$0xff]  ;;  %v1017_v3 = vpack.c.bf16 %v191_v59, %v183_v58  ;;  %v190_v5 = vld [vmem:[#allocation6 + $0x3f0] sm:$0xff]  ;;  %v583_v9 = vld [vmem:[#allocation8 + $0x88] sm:$0xff] }
  0x63   :  { %487 = vmatprep.mubr.f32.mxu1 %v1227_v0  ;;  %v987_v6 = vpack.c.bf16 %v188_v2, %v180_v1  ;;  %v1019_v7 = vpack.c.bf16 %v190_v5, %v182_v4  ;;  %v582_v8 = vld [vmem:[#allocation8 + $0x80] sm:$0xff]  ;;  %v567_v14 = vld [vmem:[#allocation8 + $0x8] sm:$0xff]  ;;  %v585_v19 = vld [vmem:[#allocation8 + $0x98] sm:$0xff] }
  0x64   :  { %968 = vmatpush1.bf16.msra.mxu0 %v967_v11  ;;  %v614_v10 = vld [vmem:[#allocation8 + $0x180] sm:$0xff]  ;;  %v1021_v11 = vpack.c.bf16 %v583_v9, %v582_v8  ;;  %v599_v18 = vld [vmem:[#allocation8 + $0x108] sm:$0xff]  ;;  %v616_v20 = vld [vmem:[#allocation8 + $0x190] sm:$0xff] }
  0x65   :  { %1000 = vmatpush1.bf16.msra.mxu1 %v999_v12  ;;  %970 = vmatprep.subr.bf16.mxu0 %v969_v13  ;;  %v615_v12 = vld [vmem:[#allocation8 + $0x188] sm:$0xff]  ;;  %v566_v13 = vld [vmem:[#allocation8] sm:$0xff]  ;;  %v617_v21 = vld [vmem:[#allocation8 + $0x198] sm:$0xff] }
  0x66   :  { %1002 = vmatprep.subr.bf16.mxu1 %v1001_v17  ;;  %v1053_v15 = vpack.c.bf16 %v615_v12, %v614_v10  ;;  %v1023_v16 = vpack.c.bf16 %v567_v14, %v566_v13  ;;  %v598_v17 = vld [vmem:[#allocation8 + $0x100] sm:$0xff]  ;;  %v568_v22 = vld [vmem:[#allocation8 + $0x10] sm:$0xff]  ;;  %v601_v27 = vld [vmem:[#allocation8 + $0x118] sm:$0xff] }
  0x67   :  { %v600_v26 = vld [vmem:[#allocation8 + $0x110] sm:$0xff]  ;;  %v587_v30 = vld [vmem:[#allocation8 + $0xa8] sm:$0xff]  ;;  %v618_v31 = vld [vmem:[#allocation8 + $0x1a0] sm:$0xff] }
  0x68   :  { %972 = vmatpush1.bf16.msra.mxu0 %v971_v23  ;;  %v569_v23 = vld [vmem:[#allocation8 + $0x18] sm:$0xff]  ;;  %v1059_v28 = vpack.c.bf16 %v601_v27, %v600_v26  ;;  %v619_v33 = vld [vmem:[#allocation8 + $0x1a8] sm:$0xff]  ;;  %v570_v34 = vld [vmem:[#allocation8 + $0x20] sm:$0xff] }
  0x69   :  { %1004 = vmatpush1.bf16.msra.mxu1 %v1003_v24  ;;  %974 = vmatprep.subr.bf16.mxu0 %v973_v25  ;;  %v1057_v24 = vpack.c.bf16 %v617_v21, %v616_v20  ;;  %v1027_v25 = vpack.c.bf16 %v569_v23, %v568_v22  ;;  %v602_v38 = vld [vmem:[#allocation8 + $0x120] sm:$0xff]  ;;  %v603_v39 = vld [vmem:[#allocation8 + $0x128] sm:$0xff]  ;;  %v589_v42 = vld [vmem:[#allocation8 + $0xb8] sm:$0xff] }
  0x6a   :  { %1006 = vmatprep.subr.bf16.mxu1 %v1005_v29  ;;  %v586_v29 = vld [vmem:[#allocation8 + $0xa0] sm:$0xff]  ;;  %v1063_v40 = vpack.c.bf16 %v603_v39, %v602_v38  ;;  %v620_v43 = vld [vmem:[#allocation8 + $0x1b0] sm:$0xff]  ;;  %v621_v45 = vld [vmem:[#allocation8 + $0x1b8] sm:$0xff] }
  0x6b   :  { %v1029_v32 = vpack.c.bf16 %v587_v30, %v586_v29  ;;  %v572_v47 = vld [vmem:[#allocation8 + $0x30] sm:$0xff]  ;;  %v605_v52 = vld [vmem:[#allocation8 + $0x138] sm:$0xff]  ;;  %v591_v55 = vld [vmem:[#allocation8 + $0xc8] sm:$0xff] }
  0x6c   :  { %976 = vmatpush1.bf16.msra.mxu0 %v975_v35  ;;  %v571_v35 = vld [vmem:[#allocation8 + $0x28] sm:$0xff]  ;;  %v604_v51 = vld [vmem:[#allocation8 + $0x130] sm:$0xff]  ;;  %v622_v56 = vld [vmem:[#allocation8 + $0x1c0] sm:$0xff] }
  0x6d   :  { %1008 = vmatpush1.bf16.msra.mxu1 %v1007_v36  ;;  %978 = vmatprep.subr.bf16.mxu0 %v977_v37  ;;  %v1061_v36 = vpack.c.bf16 %v619_v33, %v618_v31  ;;  %v1031_v37 = vpack.c.bf16 %v571_v35, %v570_v34  ;;  %v1067_v53 = vpack.c.bf16 %v605_v52, %v604_v51  ;;  %v623_v58 = vld [vmem:[#allocation8 + $0x1c8] sm:$0xff]  ;;  %v574_v59 = vld [vmem:[#allocation8 + $0x40] sm:$0xff]  ;;  %v592_v4 = vld [vmem:[#allocation8 + $0xd0] sm:$0xff] }
  0x6e   :  { %1010 = vmatprep.subr.bf16.mxu1 %v1009_v41  ;;  %v588_v41 = vld [vmem:[#allocation8 + $0xb0] sm:$0xff]  ;;  %v606_v1 = vld [vmem:[#allocation8 + $0x140] sm:$0xff]  ;;  %v607_v2 = vld [vmem:[#allocation8 + $0x148] sm:$0xff] }
  0x6f   :  { %v1033_v44 = vpack.c.bf16 %v589_v42, %v588_v41  ;;  %v593_v5 = vld [vmem:[#allocation8 + $0xd8] sm:$0xff]  ;;  %v576_v9 = vld [vmem:[#allocation8 + $0x50] sm:$0xff]  ;;  %v579_v20 = vld [vmem:[#allocation8 + $0x68] sm:$0xff] }
  0x70   :  { %980 = vmatpush1.bf16.msra.mxu0 %v979_v48  ;;  %v573_v48 = vld [vmem:[#allocation8 + $0x38] sm:$0xff]  ;;  %v608_v13 = vld [vmem:[#allocation8 + $0x150] sm:$0xff]  ;;  %v610_v22 = vld [vmem:[#allocation8 + $0x160] sm:$0xff] }
  0x71   :  { %1012 = vmatpush1.bf16.msra.mxu1 %v1011_v49  ;;  %982 = vmatprep.subr.bf16.mxu0 %v981_v50  ;;  %v1065_v49 = vpack.c.bf16 %v621_v45, %v620_v43  ;;  %v1035_v50 = vpack.c.bf16 %v573_v48, %v572_v47  ;;  %v625_v8 = vld [vmem:[#allocation8 + $0x1d8] sm:$0xff]  ;;  %v611_v23 = vld [vmem:[#allocation8 + $0x168] sm:$0xff]  ;;  %v628_v27 = vld [vmem:[#allocation8 + $0x1f0] sm:$0xff] }
  0x72   :  { %1014 = vmatprep.subr.bf16.mxu1 %v1013_v54  ;;  %v590_v54 = vld [vmem:[#allocation8 + $0xc0] sm:$0xff]  ;;  %v577_v10 = vld [vmem:[#allocation8 + $0x58] sm:$0xff]  ;;  %v580_v30 = vld [vmem:[#allocation8 + $0x70] sm:$0xff] }
  0x73   :  { %v1037_v57 = vpack.c.bf16 %v591_v55, %v590_v54  ;;  %v1043_v12 = vpack.c.bf16 %v577_v10, %v576_v9  ;;  %v609_v14 = vld [vmem:[#allocation8 + $0x158] sm:$0xff]  ;;  %v612_v34 = vld [vmem:[#allocation8 + $0x170] sm:$0xff] }
  0x74   :  { %984 = vmatpush1.bf16.msra.mxu0 %v983_v60  ;;  %v575_v60 = vld [vmem:[#allocation8 + $0x48] sm:$0xff]  ;;  %v597_v26 = vld [vmem:[#allocation8 + $0xf8] sm:$0xff] }
  0x75   :  { %1016 = vmatpush1.bf16.msra.mxu1 %v1015_v62  ;;  %986 = vmatprep.subr.bf16.mxu0 %v985_v63  ;;  %v1069_v62 = vpack.c.bf16 %v623_v58, %v622_v56  ;;  %v1039_v63 = vpack.c.bf16 %v575_v60, %v574_v59  ;;  %v629_v29 = vld [vmem:[#allocation8 + $0x1f8] sm:$0xff] }
  0x76   :  { %1018 = vmatprep.subr.bf16.mxu1 %v1017_v3  ;;  %v1071_v3 = vpack.c.bf16 %v607_v2, %v606_v1  ;;  %v581_v31 = vld [vmem:[#allocation8 + $0x78] sm:$0xff] }
  0x77   :  { %v1051_v33 = vpack.c.bf16 %v581_v31, %v580_v30  ;;  %v613_v35 = vld [vmem:[#allocation8 + $0x178] sm:$0xff] }
  0x78   :  { %988 = vmatpush1.bf16.msra.mxu0 %v987_v6  ;;  %v624_v6 = vld [vmem:[#allocation8 + $0x1d0] sm:$0xff] }
  0x79   :  { %1020 = vmatpush1.bf16.msra.mxu1 %v1019_v7  ;;  %1022 = vmatprep.subr.bf16.mxu0 %v1021_v11  ;;  %v1041_v7 = vpack.c.bf16 %v593_v5, %v592_v4  ;;  %v1073_v11 = vpack.c.bf16 %v625_v8, %v624_v6 }
  0x7a   :  { %1054 = vmatprep.subr.bf16.mxu1 %v1053_v15  ;;  %v1075_v15 = vpack.c.bf16 %v609_v14, %v608_v13 }
  0x7b   :  { %411 = vmatmul.mubr.f32.vlgmr.msra.gmra.mrb[4].mxu0 %v1293_v46 }
  0x7c   :  { %488 = vmatmul.mubr.f32.vlgmr.msra.gmra.mrb[4].mxu1 %v1293_v46  ;;  %416 = vmatprep.mubr.f32.mxu0 %v1227_v0  ;;  %v1055_v46 = vpack.c.bf16 %v599_v18, %v598_v17  ;;  %v595_v17 = vld [vmem:[#allocation8 + $0xe8] sm:$0xff]  ;;  %v626_v18 = vld [vmem:[#allocation8 + $0x1e0] sm:$0xff] }
  0x7d   :  { %493 = vmatprep.mubr.f32.mxu1 %v1227_v0  ;;  %1024 = vmatpush3.bf16.msra.mxu0 %v1023_v16  ;;  %v584_v0 = vld [vmem:[#allocation8 + $0x90] sm:$0xff]  ;;  %v594_v16 = vld [vmem:[#allocation8 + $0xe0] sm:$0xff] }
  0x7e   :  { %1056 = vmatpush3.bf16.msra.mxu1 %v1055_v46  ;;  %v1045_v46 = vpack.c.bf16 %v595_v17, %v594_v16 }
  0x7f   :  { %417 = vmatmul.mubr.f32.gmra.mrb[6].mxu0 %v1297_v61  ;;  %1058 = vmatprep.subr.bf16.mxu1 %v1057_v24  ;;  %v1079_v24 = vpack.c.bf16 %v611_v23, %v610_v22 }
  0x80   :  { %494 = vmatmul.mubr.f32.gmra.mrb[6].mxu1 %v1297_v61  ;;  %v1025_v61 = vpack.c.bf16 %v585_v19, %v584_v0  ;;  %v627_v0 = vld [vmem:[#allocation8 + $0x1e8] sm:$0xff]  ;;  %v578_v19 = vld [vmem:[#allocation8 + $0x60] sm:$0xff] }
  0x81   :  { %v1047_v21 = vpack.c.bf16 %v579_v20, %v578_v19 }
  0x82   :  { %1026 = vmatprep.subr.bf16.mxu0 %v1025_v61  ;;  %1060 = vmatpush3.bf16.msra.mxu1 %v1059_v28  ;;  %v1077_v61 = vpack.c.bf16 %v627_v0, %v626_v18 }
  0x83   :  { %1028 = vmatpush3.bf16.msra.mxu0 %v1027_v25  ;;  %1062 = vmatprep.subr.bf16.mxu1 %v1061_v36  ;;  %v596_v25 = vld [vmem:[#allocation8 + $0xf0] sm:$0xff]  ;;  %v1083_v36 = vpack.c.bf16 %v613_v35, %v612_v34 }
  0x84   :  { %1030 = vmatprep.subr.bf16.mxu0 %v1029_v32  ;;  %v1049_v28 = vpack.c.bf16 %v597_v26, %v596_v25  ;;  %v1081_v32 = vpack.c.bf16 %v629_v29, %v628_v27 }
  0x86   :  { %1064 = vmatpush3.bf16.msra.mxu1 %v1063_v40 }
  0x87   :  { %1032 = vmatpush3.bf16.msra.mxu0 %v1031_v37  ;;  %1066 = vmatprep.subr.bf16.mxu1 %v1065_v49 }
  0x88   :  { %1034 = vmatprep.subr.bf16.mxu0 %v1033_v44 }
  0x8a   :  { %1068 = vmatpush3.bf16.msra.mxu1 %v1067_v53 }
  0x8b   :  { %1036 = vmatpush3.bf16.msra.mxu0 %v1035_v50  ;;  %1070 = vmatprep.subr.bf16.mxu1 %v1069_v62 }
  0x8c   :  { %1038 = vmatprep.subr.bf16.mxu0 %v1037_v57 }
  0x8e   :  { %1072 = vmatpush3.bf16.msra.mxu1 %v1071_v3 }
  0x8f   :  { %1040 = vmatpush3.bf16.msra.mxu0 %v1039_v63  ;;  %1074 = vmatprep.subr.bf16.mxu1 %v1073_v11 }
  0x90   :  { %1042 = vmatprep.subr.bf16.mxu0 %v1041_v7 }
  0x92   :  { %1076 = vmatpush3.bf16.msra.mxu1 %v1075_v15 }
  0x93   :  { %1044 = vmatpush3.bf16.msra.mxu0 %v1043_v12  ;;  %1078 = vmatprep.subr.bf16.mxu1 %v1077_v61 }
  0x94   :  { %1046 = vmatprep.subr.bf16.mxu0 %v1045_v46 }
  0x96   :  { %1080 = vmatpush3.bf16.msra.mxu1 %v1079_v24 }
  0x97   :  { %1048 = vmatpush3.bf16.msra.mxu0 %v1047_v21  ;;  %1082 = vmatprep.subr.bf16.mxu1 %v1081_v32 }
  0x98   :  { %1050 = vmatprep.subr.bf16.mxu0 %v1049_v28 }
  0x9a   :  { %1084 = vmatpush3.bf16.msra.mxu1 %v1083_v36 }
  0x9b   :  { %1052 = vmatpush3.bf16.msra.mxu0 %v1051_v33 }
 0x12e   :  { %v258_v37 = vpop.f32.mrb[0].mxu0 }
 0x12f   :  { %v809_v38 = vmul.f32 -1.442695, %v258_v37  ;;  %v335_v39 = vpop.f32.mrb[0].mxu1  ;;  %v260_v40 = vpop.f32.mrb[1].mxu0 }
 0x130   :  { %v811_v41 = vmul.f32 -1.442695, %v335_v39  ;;  %v810_v42 = vmul.f32 -1.442695, %v260_v40  ;;  %v337_v43 = vpop.f32.mrb[1].mxu1 }
 0x131   :  { %1094 = vpow2.f32 %v809_v38  ;;  %v812_v44 = vmul.f32 -1.442695, %v337_v43 }
 0x132   :  { %1096 = vpow2.f32 %v811_v41  ;;  %v264_v45 = vpop.f32.mrb[2].mxu0 }
 0x133   :  { %1098 = vpow2.f32 %v810_v42  ;;  %v813_v47 = vmul.f32 -1.442695, %v264_v45  ;;  %v341_v48 = vpop.f32.mrb[2].mxu1  ;;  %v266_v49 = vpop.f32.mrb[3].mxu0 }
 0x134   :  { %1100 = vpow2.f32 %v812_v44  ;;  %v815_v50 = vmul.f32 -1.442695, %v341_v48  ;;  %v814_v51 = vmul.f32 -1.442695, %v266_v49  ;;  %v343_v52 = vpop.f32.mrb[3].mxu1 }
 0x135   :  { %1102 = vpow2.f32 %v813_v47  ;;  %v816_v53 = vmul.f32 -1.442695, %v343_v52 }
 0x136   :  { %1104 = vpow2.f32 %v815_v50 }
 0x137   :  { %1106 = vpow2.f32 %v814_v51 }
 0x138   :  { %1108 = vpow2.f32 %v816_v53 }
 0x13b   :  { %v1095_v54 = vpop.eup %1094 }
 0x13c   :  { %v1097_v55 = vpop.eup %1096  ;;  %v524_v56 = vadd.f32 1.0, %v1095_v54 }
 0x13d   :  { %v1099_v57 = vpop.eup %1098  ;;  %v526_v58 = vadd.f32 1.0, %v1097_v55 }
 0x13e   :  { %v1101_v59 = vpop.eup %1100  ;;  %v525_v60 = vadd.f32 1.0, %v1099_v57  ;;  %1110 = vrcp.f32 %v524_v56 }
 0x13f   :  { %v1103_v62 = vpop.eup %1102  ;;  %v527_v63 = vadd.f32 1.0, %v1101_v59  ;;  %1112 = vrcp.f32 %v526_v58 }
 0x140   :  { %v1105_v1 = vpop.eup %1104  ;;  %v528_v2 = vadd.f32 1.0, %v1103_v62  ;;  %1114 = vrcp.f32 %v525_v60 }
 0x141   :  { %v1107_v3 = vpop.eup %1106  ;;  %v530_v4 = vadd.f32 1.0, %v1105_v1  ;;  %1116 = vrcp.f32 %v527_v63 }
 0x142   :  { %v1109_v5 = vpop.eup %1108  ;;  %v529_v6 = vadd.f32 1.0, %v1107_v3  ;;  %1118 = vrcp.f32 %v528_v2 }
 0x143   :  { %v531_v7 = vadd.f32 1.0, %v1109_v5  ;;  %1120 = vrcp.f32 %v530_v4 }
 0x144   :  { %1122 = vrcp.f32 %v529_v6 }
 0x145   :  { %1124 = vrcp.f32 %v531_v7 }
 0x148   :  { %v1111_v8 = vpop.eup %1110 }
 0x149   :  { %v1113_v9 = vpop.eup %1112  ;;  %v548_v13 = vmul.f32 %v1111_v8, %v258_v37 }
 0x14a   :  { %v1115_v10 = vpop.eup %1114  ;;  %v550_v15 = vmul.f32 %v1113_v9, %v335_v39 }
 0x14b   :  { %v1117_v11 = vpop.eup %1116  ;;  %v549_v16 = vmul.f32 %v1115_v10, %v260_v40 }
 0x14c   :  { %v1119_v12 = vpop.eup %1118  ;;  %v551_v46 = vmul.f32 %v1117_v11, %v337_v43 }
 0x14d   :  { %v1121_v14 = vpop.eup %1120  ;;  %v552_v24 = vmul.f32 %v1119_v12, %v264_v45 }
 0x14e   :  { %v412_v17 = vpop.f32.mrb[4].mxu0  ;;  %v1123_v18 = vpop.eup %1122  ;;  %v554_v26 = vmul.f32 %v1121_v14, %v341_v48 }
 0x14f   :  { %v556_v0 = vmul.f32 %v548_v13, %v412_v17  ;;  %v489_v19 = vpop.f32.mrb[4].mxu1  ;;  %v414_v20 = vpop.f32.mrb[5].mxu0  ;;  %v553_v27 = vmul.f32 %v1123_v18, %v266_v49 }
 0x150   :  { %v1125_v61 = vpop.eup %1124  ;;  %v558_v21 = vmul.f32 %v550_v15, %v489_v19  ;;  %v557_v22 = vmul.f32 %v549_v16, %v414_v20  ;;  %v491_v23 = vpop.f32.mrb[5].mxu1 }
 0x151   :  { %v559_v25 = vmul.f32 %v551_v46, %v491_v23  ;;  %v555_v29 = vmul.f32 %v1125_v61, %v343_v52 }
 0x152   :  { %v418_v28 = vpop.f32.mrb[6].mxu0  ;;  %694 = vmatprep.mubr.f32.mxu0 %v557_v22 }
 0x153   :  { %v560_v30 = vmul.f32 %v552_v24, %v418_v28  ;;  %v495_v31 = vpop.f32.mrb[6].mxu1  ;;  %769 = vmatprep.mubr.f32.mxu1 %v559_v25  ;;  %v420_v32 = vpop.f32.mrb[7].mxu0  ;;  %695 = vmatmul.mubr.f32.vlgmr.msra.gmra.mrb[8].mxu0 %v556_v0 }
 0x154   :  { %v562_v33 = vmul.f32 %v554_v26, %v495_v31  ;;  %v561_v34 = vmul.f32 %v553_v27, %v420_v32  ;;  %v497_v35 = vpop.f32.mrb[7].mxu1  ;;  %770 = vmatmul.mubr.f32.vlgmr.msra.gmra.mrb[8].mxu1 %v558_v21 }
 0x155   :  { %v563_v36 = vmul.f32 %v555_v29, %v497_v35 }
 0x156   :  { %699 = vmatprep.mubr.f32.mxu0 %v561_v34 }
 0x157   :  { %774 = vmatprep.mubr.f32.mxu1 %v563_v36  ;;  %700 = vmatmul.mubr.f32.gmra.mrb[10].mxu0 %v560_v30 }
 0x158   :  { %775 = vmatmul.mubr.f32.gmra.mrb[10].mxu1 %v562_v33 }
 0x226   :  { %v849_v37 = vpop.f32.mrb[8].mxu0 }
 0x227   :  { %v887_v38 = vpop.f32.mrb[8].mxu1  ;;  %v850_v39 = vpop.f32.mrb[9].mxu0 }
 0x228   :  { %v851_v40 = vadd.f32 %v850_v39, %v849_v37  ;;  %v888_v41 = vpop.f32.mrb[9].mxu1 }
 0x229   :  { %v889_v42 = vadd.f32 %v888_v41, %v887_v38 }
 0x22a   :  { %v852_v43 = vpop.f32.mrb[10].mxu0 }
 0x22b   :  { %v772_v44 = vadd.f32 %v889_v42, %v851_v40  ;;  %v890_v45 = vpop.f32.mrb[10].mxu1  ;;  %v853_v47 = vpop.f32.mrb[11].mxu0 }
 0x22c   :  { %v854_v48 = vadd.f32 %v853_v47, %v852_v43  ;;  %v891_v49 = vpop.f32.mrb[11].mxu1 }
 0x22d   :  { %789 = vst [vmem:[#allocation9] sm:$0xff] %v772_v44  ;;  %v892_v50 = vadd.f32 %v891_v49, %v890_v45 }
 0x22f   :  { %v777_v51 = vadd.f32 %v892_v50, %v854_v48 }
 0x231   :  { %790 = vst [vmem:[#allocation9 + $0x8] sm:$0xff] %v777_v51 }
 0x232   :  { %1203 = shalt.err (!%p1200_p0)
}
 0x233   :  { %s1204_s27 = scalar_lea.hbm %s1329_s3, 256 }
 0x234   :  { %p1205_p1 = scmp.ne.s32.totalorder %s1329_s3, %s1204_s27  ;;  %p1208_p2 = scmp.lt.u32.totalorder %s1204_s27, %s1329_s3 }
 0x236   :  { %p1210_p3 = pnand %p1208_p2, %p1205_p1 }
 0x238   :  { %1213 = shalt.err (!%p1210_p3)
}
 0x239   :  { %802 = dma.vmem_to_hbm [thread:$0]  %s797_s23, 256, %s1329_s3, [#allocation5], %s1224_s1, %s1224_s1, %s1225_s9  }
 0x23a   :  { %1218 = dma.done.wait [#allocation5], 256  }
 0x23b   :  { %1219 = vsyncadd [#allocation5], 4294967040 }
 0x23c   :  { %806 = vsyncpa [#allocation4], 1 }
 0x23d   :  { %807 = vsyncpa [#allocation7], 1 }
 0x23e   :  { %808 = vsyncpa [#allocation5], 1 }

</bundles_post_ra>
